<compile_context>
chip_gen: v5e
topology: v5e:2x2
jax: 0.10.0
libtpu: 0.0.40
codegen_flags: <defaults>
</compile_context>

<pallas_src>
import functools

import jax
import jax.numpy as jnp
from jax.experimental import pallas as pl
from jax.experimental.pallas import tpu as pltpu


def _maxpool2d_kernel(x_ref, o_ref, *scratch, kernel_size, stride, padding,
                      dilation, h_in, w_in, h_out, w_out, lane_chunk, min_val):
    """Max-pool the first two dims of an (H, W, TN) block -> (h_out, w_out, TN)."""
    k, s, p, d = kernel_size, stride, padding, dilation
    tn = o_ref.shape[-1]

    if p > 0:
        # Folded padding: fill a halo VMEM scratch with the identity element
        # and copy the input block into its interior (refreshed every grid
        # step, so it is safe when the lane axis is sharded across cores).
        # All window reads below are then unconditionally in-bounds and the
        # output is written with dense stores only.
        pad_ref, = scratch
        pad_ref[...] = jnp.full(pad_ref.shape, min_val, pad_ref.dtype)
        pad_ref[p:p + h_in, p:p + w_in, :] = x_ref[...]
        src = pad_ref
    else:
        src = x_ref

    def window(di, dj, lane):
        # Strided window read; strides only on the leading / sublane dims.
        r0, c0 = di * d, dj * d
        rows = pl.ds(r0, h_out, stride=s) if s > 1 else pl.ds(r0, h_out)
        cols = pl.ds(c0, w_out, stride=s) if s > 1 else pl.ds(c0, w_out)
        return src[rows, cols, lane]

    # Lane-chunked register accumulation: each chunk's (h_out, w_out, CH)
    # accumulator plus one window stays in vregs; one dense, 128-aligned,
    # unmasked store per chunk.
    for c in range(tn // lane_chunk):
        lane = pl.ds(c * lane_chunk, lane_chunk)
        acc = window(0, 0, lane)
        for di in range(k):
            for dj in range(k):
                if di == 0 and dj == 0:
                    continue
                acc = jnp.maximum(acc, window(di, dj, lane))
        o_ref[:, :, lane] = acc


def complex_max_pool2d(x, kernel_size, stride=None, padding=0, dilation=1,
                       return_indices=False, ceil_mode=False):
    """x: (B, 2, C, H, W) -> (B, 2, C, H_out, W_out), matching nn.MaxPool2d."""
    if return_indices:
        raise NotImplementedError("return_indices=True is not supported")
    if ceil_mode:
        raise NotImplementedError("ceil_mode=True is not supported")
    if stride is None:
        stride = kernel_size
    k, s, p, d = int(kernel_size), int(stride), int(padding), int(dilation)
    if p > k // 2:
        raise ValueError("padding must be at most half the kernel size "
                         "(same constraint as torch.nn.MaxPool2d)")

    B, two, C, H, W = x.shape
    if two != 2:
        raise ValueError("expected complex dim of size 2 at axis 1")
    h_out = (H + 2 * p - d * (k - 1) - 1) // s + 1
    w_out = (W + 2 * p - d * (k - 1) - 1) // s + 1
    if h_out <= 0 or w_out <= 0:
        raise ValueError("pooling output size would be non-positive")

    dtype = x.dtype
    itemsize = jnp.dtype(dtype).itemsize
    if jnp.issubdtype(dtype, jnp.floating):
        min_val = float("-inf")
    else:
        min_val = int(jnp.iinfo(dtype).min)

    N = B * 2 * C
    LANE = 128
    n128 = pl.cdiv(N, LANE) * LANE

    # --- lane-tile (TN) sizing: generation-aware VMEM budget -----------------
    hp, wp = H + 2 * p, W + 2 * p
    scratch_per_lane = hp * wp if p > 0 else 0
    # 2x double-buffered input + 2x double-buffered output + halo scratch.
    per_lane_bytes = (2 * H * W + 2 * h_out * w_out + scratch_per_lane) * itemsize
    try:
        vmem_cap = int(pltpu.get_tpu_info().vmem_capacity_bytes)
    except Exception:  # conservative fallback (v7x per-core size)
        vmem_cap = 64 << 20
    budget = max(4 << 20, (2 * vmem_cap) // 5)           # ~40% of physical VMEM
    tn_vmem = max(LANE, (budget // per_lane_bytes) // LANE * LANE)

    target = min(tn_vmem, 2048, n128)
    if n128 >= 2 * LANE:
        # Guarantee >= 2 grid steps: shards across v7x's two TensorCores and
        # gives the BlockSpec pipeline something to overlap; harmless on
        # single-TC v5e/v6e (slightly smaller blocks).
        target = min(target, (n128 // 2) // LANE * LANE)
    target = max(LANE, target)
    # Prefer the largest TN <= target dividing the 128-rounded N (no padded
    # lanes); otherwise keep the large target and pad N up to a TN multiple.
    TN = LANE
    for cand in range(target, LANE - 1, -LANE):
        if n128 % cand == 0:
            TN = cand
            break
    if TN < max(LANE, target // 2):
        TN = target
    N_pad = pl.cdiv(N, TN) * TN
    grid_n = N_pad // TN

    # Lane chunk for in-register accumulation (acc stays well under 64 vregs).
    CH = 128
    if TN % 256 == 0 and h_out * w_out * 256 * itemsize <= (96 << 10):
        CH = 256

    # --- layout glue ----------------------------------------------------------
    # channels-last so N = B*2*C rides the 128-lane axis.  The lane pad (only
    # if N % TN != 0) and the output lane slice fuse into these transposes.
    # TODO(synk): keep activations (H, W, N) across neighbouring ops to drop
    # these two remaining HBM passes entirely.
    xt = jnp.transpose(x.reshape(N, H, W), (1, 2, 0))             # (H, W, N)
    if N_pad != N:
        xt = jnp.pad(xt, ((0, 0), (0, 0), (0, N_pad - N)))

    kernel = functools.partial(
        _maxpool2d_kernel, kernel_size=k, stride=s, padding=p, dilation=d,
        h_in=H, w_in=W, h_out=h_out, w_out=w_out, lane_chunk=CH,
        min_val=min_val)

    scratch_shapes = []
    if p > 0:
        scratch_shapes.append(pltpu.VMEM((hp, wp, TN), dtype))

    block_bytes = per_lane_bytes * TN
    vmem_limit = int(min(vmem_cap, max(block_bytes + (8 << 20), 32 << 20)))

    cost = pl.CostEstimate(
        flops=(k * k - 1) * h_out * w_out * N_pad,
        bytes_accessed=(H * W + h_out * w_out) * N_pad * itemsize,
        transcendentals=0)

    out = pl.pallas_call(
        kernel,
        out_shape=jax.ShapeDtypeStruct((h_out, w_out, N_pad), dtype),
        grid=(grid_n,),
        in_specs=[pl.BlockSpec((H, W, TN), lambda n: (0, 0, n))],
        out_specs=pl.BlockSpec((h_out, w_out, TN), lambda n: (0, 0, n)),
        scratch_shapes=scratch_shapes,
        compiler_params=pltpu.CompilerParams(
            dimension_semantics=("parallel",),
            vmem_limit_bytes=vmem_limit),
        cost_estimate=cost,
    )(xt)

    if N_pad != N:
        out = out[:, :, :N]                                       # drop lane pad
    return jnp.transpose(out, (2, 0, 1)).reshape(B, 2, C, h_out, w_out)


def _reference(x, kernel_size, stride=None, padding=0, dilation=1):
    """Plain-JAX reference (reduce_window) mirroring nn.MaxPool2d."""
    if stride is None:
        stride = kernel_size
    B, two, C, H, W = x.shape
    xf = x.reshape(B * two * C, H, W)
    if padding:
        xf = jnp.pad(xf, ((0, 0), (padding, padding), (padding, padding)),
                     constant_values=-jnp.inf)
    out = jax.lax.reduce_window(
        xf, -jnp.inf, jax.lax.max,
        window_dimensions=(1, kernel_size, kernel_size),
        window_strides=(1, stride, stride),
        padding="VALID",
        window_dilation=(1, dilation, dilation))
    return out.reshape(B, two, C, out.shape[-2], out.shape[-1])


if __name__ == "__main__":
    key = jax.random.PRNGKey(0)
    # (B, 2, C, H, W) — complex-valued feature map, matching the module.
    x = jax.random.normal(key, (2, 2, 4, 16, 16), dtype=jnp.float32)

    # Default usage: kernel_size=2 -> stride=2, padding=0 (non-overlapping).
    out = jax.block_until_ready(complex_max_pool2d(x, kernel_size=2))
    ref = _reference(x, kernel_size=2)
    assert out.shape == (2, 2, 4, 8, 8), out.shape
    assert jnp.allclose(out, ref), "mismatch vs reference (kernel_size=2)"

    # Padded, overlapping-window path (exercises the folded-min halo scratch).
    out2 = jax.block_until_ready(
        complex_max_pool2d(x, kernel_size=3, stride=2, padding=1))
    ref2 = _reference(x, kernel_size=3, stride=2, padding=1)
    assert out2.shape == ref2.shape, (out2.shape, ref2.shape)
    assert jnp.allclose(out2, ref2), "mismatch vs reference (k=3, s=2, p=1)"

    # Dilation path (stride=1 -> contiguous window reads).
    out3 = jax.block_until_ready(
        complex_max_pool2d(x, kernel_size=2, stride=1, dilation=2))
    ref3 = _reference(x, kernel_size=2, stride=1, dilation=2)
    assert jnp.allclose(out3, ref3), "mismatch vs reference (k=2, s=1, d=2)"

    print("KERNEL_OK")
</pallas_src>

<mosaic_0001>
module attributes {stable_mosaic.version = 11 : i64} {
  func.func @_maxpool2d_kernel(%arg0: i32, %arg1: memref<16x16x128xf32, #tpu.memory_space<vmem>>, %arg2: memref<8x8x128xf32, #tpu.memory_space<vmem>>) attributes {dimension_semantics = [#tpu.dimension_semantics<parallel>], iteration_bounds = array<i64: 1>, scalar_prefetch = 0 : i64, scratch_operands = 0 : i64, tpu.core_type = #tpu.core_type<tc>, window_params = [{transform_indices = @transform_0, window_bounds = array<i64: 16, 16, 128>}, {transform_indices = @transform_1, window_bounds = array<i64: 8, 8, 128>}]} {
    %c0 = arith.constant 0 : index
    %c0_0 = arith.constant 0 : index
    %c0_1 = arith.constant 0 : index
    %0 = tpu.strided_load %arg1[%c0, %c0_0, %c0_1] {strides = array<i32: 2, 2, 1>} : memref<16x16x128xf32, #tpu.memory_space<vmem>>, vector<8x8x128xf32>
    %c0_2 = arith.constant 0 : index
    %c1 = arith.constant 1 : index
    %c0_3 = arith.constant 0 : index
    %1 = tpu.strided_load %arg1[%c0_2, %c1, %c0_3] {strides = array<i32: 2, 2, 1>} : memref<16x16x128xf32, #tpu.memory_space<vmem>>, vector<8x8x128xf32>
    %2 = arith.maximumf %0, %1 : vector<8x8x128xf32>
    %c1_4 = arith.constant 1 : index
    %c0_5 = arith.constant 0 : index
    %c0_6 = arith.constant 0 : index
    %3 = tpu.strided_load %arg1[%c1_4, %c0_5, %c0_6] {strides = array<i32: 2, 2, 1>} : memref<16x16x128xf32, #tpu.memory_space<vmem>>, vector<8x8x128xf32>
    %4 = arith.maximumf %2, %3 : vector<8x8x128xf32>
    %c1_7 = arith.constant 1 : index
    %c1_8 = arith.constant 1 : index
    %c0_9 = arith.constant 0 : index
    %5 = tpu.strided_load %arg1[%c1_7, %c1_8, %c0_9] {strides = array<i32: 2, 2, 1>} : memref<16x16x128xf32, #tpu.memory_space<vmem>>, vector<8x8x128xf32>
    %6 = arith.maximumf %4, %5 : vector<8x8x128xf32>
    %c0_10 = arith.constant 0 : index
    %c0_11 = arith.constant 0 : index
    %c0_12 = arith.constant 0 : index
    %7 = vector.load %arg2[%c0_10, %c0_11, %c0_12] : memref<8x8x128xf32, #tpu.memory_space<vmem>>, vector<8x8x128xf32>
    tpu.vector_store %arg2[%c0_10, %c0_11, %c0_12], %6 {strides = array<i32>} : memref<8x8x128xf32, #tpu.memory_space<vmem>>, vector<8x8x128xf32>,
    return
  }
  func.func @transform_0(%arg0: i32) -> (i32, i32, i32) {
    %c0_i32 = arith.constant 0 : i32
    %c0_i32_0 = arith.constant 0 : i32
    %c0_i32_1 = arith.constant 0 : i32
    return %c0_i32, %c0_i32_0, %arg0 : i32, i32, i32
  }
  func.func @transform_1(%arg0: i32) -> (i32, i32, i32) {
    %c0_i32 = arith.constant 0 : i32
    %c0_i32_0 = arith.constant 0 : i32
    %c0_i32_1 = arith.constant 0 : i32
    return %c0_i32, %c0_i32_0, %arg0 : i32, i32, i32
  }
}

</mosaic_0001>

<bundles_post_ra>
// kernel: tpu_custom_call.1
= control target key start
LH: loop header
LB: loop body
LE: loop exit
PB: predicated region body
PF: predicated region fallthrough
CT: control target
= control target key end

     0   :  { %6 = vsyncpa [#allocation3], 0  ;;  %s236_s0 = inlined_call_operand.hbm [shape: f32[16,16,128], index: 0, kind: input, shape index: {}]   ;;  %s237_s1 = inlined_call_operand.hbm [shape: f32[8,8,128], index: 1, kind: output, shape index: {}]  }
   0x1   :  { %7 = vsyncpa [#allocation4], 0  ;;  %s12_s8 = sshll.u32 %s236_s0, 4  ;;  %s210_s9 = smov [#allocation2]   ;;  %s13_s8 = int_to_ptr.hbm [resolvable:$true] %s12_s8 }
   0x2   :  { %s14_s10 = sshll.u32 %s210_s9, 4  ;;  %s211_s11 = smov 128   ;;  %s15_s10 = int_to_ptr.vmem [resolvable:$true] %s14_s10 }
   0x3   :  { %s212_s12 = smov 8  }
   0x4   :  { %20 = dma.hbm_to_vmem [thread:$0]  %s13_s8, 4096, %s15_s10, [#allocation3], %s211_s11, %s211_s11, %s212_s12  }
   0x5   :  { %206 = dma.done.wait [#allocation3], 4096  }
   0x6   :  { %207 = vsyncadd [#allocation3], 4294963200  ;;  %v25_v0 = vld [vmem:[#allocation2] ss:$2 sm:$0xff]  ;;  %v41_v1 = vld [vmem:[#allocation2 + $0x1] ss:$2 sm:$0xff] }
   0x7   :  { %v65_v2 = vld [vmem:[#allocation2 + $0x10] ss:$2 sm:$0xff]  ;;  %v56_v3 = vmax.f32 %v25_v0, %v41_v1  ;;  %v89_v4 = vld [vmem:[#allocation2 + $0x11] ss:$2 sm:$0xff]  ;;  %v27_v5 = vld [vmem:[#allocation2 + $0x20] ss:$2 sm:$0xff] }
   0x8   :  { %v43_v6 = vld [vmem:[#allocation2 + $0x21] ss:$2 sm:$0xff]  ;;  %v67_v8 = vld [vmem:[#allocation2 + $0x30] ss:$2 sm:$0xff]  ;;  %v91_v9 = vld [vmem:[#allocation2 + $0x31] ss:$2 sm:$0xff] }
   0x9   :  { %v57_v7 = vmax.f32 %v27_v5, %v43_v6  ;;  %v29_v10 = vld [vmem:[#allocation2 + $0x40] ss:$2 sm:$0xff]  ;;  %v80_v11 = vmax.f32 %v56_v3, %v65_v2  ;;  %v45_v12 = vld [vmem:[#allocation2 + $0x41] ss:$2 sm:$0xff]  ;;  %v69_v13 = vld [vmem:[#allocation2 + $0x50] ss:$2 sm:$0xff] }
   0xa   :  { %v93_v14 = vld [vmem:[#allocation2 + $0x51] ss:$2 sm:$0xff]  ;;  %v58_v16 = vmax.f32 %v29_v10, %v45_v12  ;;  %v31_v17 = vld [vmem:[#allocation2 + $0x60] ss:$2 sm:$0xff]  ;;  %v47_v18 = vld [vmem:[#allocation2 + $0x61] ss:$2 sm:$0xff] }
   0xb   :  { %v81_v15 = vmax.f32 %v57_v7, %v67_v8  ;;  %v71_v19 = vld [vmem:[#allocation2 + $0x70] ss:$2 sm:$0xff]  ;;  %v104_v20 = vmax.f32 %v80_v11, %v89_v4  ;;  %v59_v21 = vmax.f32 %v31_v17, %v47_v18  ;;  %v95_v22 = vld [vmem:[#allocation2 + $0x71] ss:$2 sm:$0xff]  ;;  %v33_v23 = vld [vmem:[#allocation2 + $0x80] ss:$2 sm:$0xff] }
   0xc   :  { %v49_v24 = vld [vmem:[#allocation2 + $0x81] ss:$2 sm:$0xff]  ;;  %v82_v26 = vmax.f32 %v58_v16, %v69_v13  ;;  %v73_v28 = vld [vmem:[#allocation2 + $0x90] ss:$2 sm:$0xff]  ;;  %v97_v29 = vld [vmem:[#allocation2 + $0x91] ss:$2 sm:$0xff] }
   0xd   :  { %v105_v25 = vmax.f32 %v81_v15, %v91_v9  ;;  %v60_v27 = vmax.f32 %v33_v23, %v49_v24  ;;  %v35_v30 = vld [vmem:[#allocation2 + $0xa0] ss:$2 sm:$0xff]  ;;  %112 = vst [vmem:[#allocation5] sm:$0xff] %v104_v20  ;;  %v83_v31 = vmax.f32 %v59_v21, %v71_v19  ;;  %v51_v32 = vld [vmem:[#allocation2 + $0xa1] ss:$2 sm:$0xff]  ;;  %s213_s0 = smov [#allocation5]  }
   0xe   :  { %v75_v33 = vld [vmem:[#allocation2 + $0xb0] ss:$2 sm:$0xff]  ;;  %v106_v34 = vmax.f32 %v82_v26, %v93_v14  ;;  %v61_v36 = vmax.f32 %v35_v30, %v51_v32  ;;  %v37_v37 = vld [vmem:[#allocation2 + $0xc0] ss:$2 sm:$0xff]  ;;  %v99_v39 = vld [vmem:[#allocation2 + $0xb1] ss:$2 sm:$0xff] }
   0xf   :  { %113 = vst [vmem:[#allocation5 + $0x8] sm:$0xff] %v105_v25  ;;  %v84_v35 = vmax.f32 %v60_v27, %v73_v28  ;;  %v107_v38 = vmax.f32 %v83_v31, %v95_v22  ;;  %v53_v40 = vld [vmem:[#allocation2 + $0xc1] ss:$2 sm:$0xff]  ;;  %v77_v41 = vld [vmem:[#allocation2 + $0xd0] ss:$2 sm:$0xff]  ;;  %s124_s13 = sshll.u32 %s213_s0, 4  ;;  %s125_s13 = int_to_ptr.vmem [resolvable:$true] %s124_s13 }
  0x10   :  { %114 = vst [vmem:[#allocation5 + $0x10] sm:$0xff] %v106_v34  ;;  %v85_v43 = vmax.f32 %v61_v36, %v75_v33  ;;  %v62_v44 = vmax.f32 %v37_v37, %v53_v40  ;;  %v39_v45 = vld [vmem:[#allocation2 + $0xe0] ss:$2 sm:$0xff]  ;;  %v55_v46 = vld [vmem:[#allocation2 + $0xe1] ss:$2 sm:$0xff]  ;;  %s126_s16 = sshll.u32 %s237_s1, 4  ;;  %s127_s16 = int_to_ptr.hbm [resolvable:$true] %s126_s16 }
  0x11   :  { %v108_v42 = vmax.f32 %v84_v35, %v97_v29  ;;  %115 = vst [vmem:[#allocation5 + $0x18] sm:$0xff] %v107_v38  ;;  %v101_v47 = vld [vmem:[#allocation2 + $0xd1] ss:$2 sm:$0xff]  ;;  %v63_v48 = vmax.f32 %v39_v45, %v55_v46  ;;  %v79_v49 = vld [vmem:[#allocation2 + $0xf0] ss:$2 sm:$0xff] }
  0x12   :  { %v109_v50 = vmax.f32 %v85_v43, %v99_v39  ;;  %v86_v51 = vmax.f32 %v62_v44, %v77_v41  ;;  %v103_v52 = vld [vmem:[#allocation2 + $0xf1] ss:$2 sm:$0xff] }
  0x13   :  { %116 = vst [vmem:[#allocation5 + $0x20] sm:$0xff] %v108_v42  ;;  %v87_v53 = vmax.f32 %v63_v48, %v79_v49 }
  0x14   :  { %117 = vst [vmem:[#allocation5 + $0x28] sm:$0xff] %v109_v50  ;;  %v110_v54 = vmax.f32 %v86_v51, %v101_v47 }
  0x15   :  { %v111_v55 = vmax.f32 %v87_v53, %v103_v52 }
  0x16   :  { %118 = vst [vmem:[#allocation5 + $0x30] sm:$0xff] %v110_v54 }
  0x17   :  { %119 = vst [vmem:[#allocation5 + $0x38] sm:$0xff] %v111_v55 }
  0x18   :  { %132 = dma.vmem_to_hbm [thread:$0]  %s125_s13, 1024, %s127_s16, [#allocation4], %s211_s11, %s211_s11, %s212_s12  }
  0x19   :  { %208 = dma.done.wait [#allocation4], 1024  }
  0x1a   :  { %209 = vsyncadd [#allocation4], 4294966272 }
  0x1b   :  { %137 = vsyncpa [#allocation3], 1 }
  0x1c   :  { %138 = vsyncpa [#allocation4], 1 }

</bundles_post_ra>
